<compile_context>
chip_gen: v7x
topology: tpu7x:2x2x1
jax: 0.10.0
libtpu: 0.0.40
codegen_flags: <defaults>
</compile_context>

<pallas_src>
import jax
import jax.numpy as jnp
from jax.experimental import pallas as pl
from jax.experimental.pallas import tpu as pltpu


# ----------------------------------------------------------------------------------
# GELU (tanh approximation). Kept in f32 so it lowers on v5e (no bf16 VPU/EUP) and is
# identical across generations. |tanh-gelu - exact erf-gelu| < ~3e-3.
# TODO(synk): nn.GELU() default is the exact erf form; swap in lax.erf if exact
#             numerics are required and the Mosaic erf lowering is available.
# ----------------------------------------------------------------------------------
_SQRT_2_OVER_PI = 0.7978845608028654
_GELU_C = 0.044715


def _gelu(x):
    x3 = x * x * x
    return 0.5 * x * (1.0 + jnp.tanh(_SQRT_2_OVER_PI * (x + _GELU_C * x3)))


# ----------------------------------------------------------------------------------
# Kernels.
# ----------------------------------------------------------------------------------
def _mlp_kernel_resident(x_ref, w1_ref, b1_ref, w2_ref, b2_ref, o_ref):
    """grid = (row_tiles,). Full hidden dim resident in VMEM; weights DMA'd once."""
    h = jnp.dot(x_ref[...], w1_ref[...],
                preferred_element_type=jnp.float32) + b1_ref[...]        # (tm, Hd) f32
    h = _gelu(h)
    o_ref[...] = (jnp.dot(h.astype(jnp.bfloat16), w2_ref[...],
                          preferred_element_type=jnp.float32)
                  + b2_ref[...]).astype(o_ref.dtype)                     # (tm, Cout)


def _mlp_kernel_reduce(x_ref, w1_ref, b1_ref, w2_ref, b2_ref, o_ref):
    """grid = (row_tiles, hidden_tiles). Hidden axis is the trailing reduction;
    accumulate directly into the resident f32 output block (no scratch)."""
    j = pl.program_id(1)
    h = jnp.dot(x_ref[...], w1_ref[...],
                preferred_element_type=jnp.float32) + b1_ref[...]        # (tm, th) f32
    h = _gelu(h)
    contrib = jnp.dot(h.astype(jnp.bfloat16), w2_ref[...],
                      preferred_element_type=jnp.float32)                # (tm, Cout) f32

    @pl.when(j == 0)
    def _():
        o_ref[...] = contrib + b2_ref[...]

    @pl.when(j != 0)
    def _():
        o_ref[...] += contrib


# ----------------------------------------------------------------------------------
# VMEM-aware tile selection.
# ----------------------------------------------------------------------------------
def _vmem_capacity_bytes():
    try:
        cap = getattr(pltpu.get_tpu_info(), "vmem_capacity_bytes", None)
        if cap:
            return int(cap)
    except Exception:
        pass
    return 64 * 1024 * 1024   # conservative fallback = v7x per-TensorCore VMEM


def _footprint_bytes(tm, th, C, Cout):
    """Conservative VMEM estimate: every block double-buffered."""
    x_b = 2 * tm * C * 2            # bf16
    o_b = 2 * tm * Cout * 4         # f32
    w1_b = 2 * C * th * 2           # bf16
    w2_b = 2 * th * Cout * 2        # bf16
    b1_b = 2 * th * 4
    b2_b = 2 * Cout * 4
    return x_b + o_b + w1_b + w2_b + b1_b + b2_b


def _choose_tiles(M, C, Hd, Cout, budget):
    # bf16 x blocks pack 2 rows/sublane -> tm must be a multiple of 16 (or full extent).
    tm_cands = [t for t in (2048, 1024, 512, 256, 128, 64, 32, 16)
                if t <= M and M % t == 0]
    if not tm_cands:
        tm_cands = [M]   # full-extent block bypasses the (8,128) divisibility rule

    # --- weight-resident fast path: th = Hd, drop the hidden grid axis ------------
    resident_tms = [t for t in tm_cands if _footprint_bytes(t, Hd, C, Cout) <= budget]
    if resident_tms:
        tm = resident_tms[0]
        # v7x: prefer an even (>=2) tile count so both TensorCores get equal work.
        even = [t for t in resident_tms if (M // t) >= 2 and (M // t) % 2 == 0]
        if even:
            tm = even[0]
        return tm, Hd, True

    # --- reduction path: maximize tm first (weight traffic = (M/tm)*weights) ------
    th_cands = [t for t in (2048, 1024, 512, 256, 128) if t <= Hd and Hd % t == 0]
    if not th_cands:
        th_cands = [Hd]
    th_min = th_cands[-1]
    fitting = [t for t in tm_cands if _footprint_bytes(t, th_min, C, Cout) <= budget]
    tm = fitting[0] if fitting else tm_cands[-1]
    th = th_min
    for t in th_cands:                      # then grow th with the remaining budget
        if _footprint_bytes(tm, t, C, Cout) <= budget:
            th = t
            break
    return tm, th, False


def _as_bf16(a):
    return a if a.dtype == jnp.bfloat16 else a.astype(jnp.bfloat16)


# ----------------------------------------------------------------------------------
# Wrapper.
# ----------------------------------------------------------------------------------
def mlp(x, w1_t, b1, w2_t, b2, *, vmem_limit_bytes=None):
    """Mlp forward: gelu(x @ w1_t + b1) @ w2_t + b2 (dropout p=0 -> identity).

    x:    (..., C)
    w1_t: (C, Hd)    fc1 weight pre-transposed (PyTorch stores (Hd, C)); bf16 preferred
    b1:   (Hd,)
    w2_t: (Hd, Cout) fc2 weight pre-transposed; bf16 preferred
    b2:   (Cout,)
    Returns f32 (..., Cout).
    """
    lead = x.shape[:-1]
    C = x.shape[-1]
    Hd = w1_t.shape[1]
    Cout = w2_t.shape[1]
    M = 1
    for s in lead:
        M *= s

    # Cast x once here (bf16 halves HBM traffic / VMEM footprint vs the old f32 path).
    x2 = _as_bf16(x.reshape(M, C))
    w1_bf16 = _as_bf16(w1_t)       # no-op if caller already stores bf16 weights
    w2_bf16 = _as_bf16(w2_t)
    b1_f32 = b1.astype(jnp.float32)[None]    # (1, Hd)
    b2_f32 = b2.astype(jnp.float32)[None]    # (1, Cout)

    phys = _vmem_capacity_bytes()
    if vmem_limit_bytes is None:
        vmem_limit_bytes = int(phys * 0.9)
    budget = int(vmem_limit_bytes * 0.85)

    tm, th, resident = _choose_tiles(M, C, Hd, Cout, budget)

    if resident:
        grid = (M // tm,)
        kernel = _mlp_kernel_resident
        in_specs = [
            pl.BlockSpec((tm, C), lambda i: (i, 0)),        # x rows
            pl.BlockSpec((C, Hd), lambda i: (0, 0)),        # w1 (resident)
            pl.BlockSpec((1, Hd), lambda i: (0, 0)),        # b1 (resident)
            pl.BlockSpec((Hd, Cout), lambda i: (0, 0)),     # w2 (resident)
            pl.BlockSpec((1, Cout), lambda i: (0, 0)),      # b2 (resident)
        ]
        out_specs = pl.BlockSpec((tm, Cout), lambda i: (i, 0))
        dim_sem = ("parallel",)
    else:
        grid = (M // tm, Hd // th)
        kernel = _mlp_kernel_reduce
        in_specs = [
            pl.BlockSpec((tm, C), lambda i, j: (i, 0)),     # x rows (constant over j)
            pl.BlockSpec((C, th), lambda i, j: (0, j)),     # w1 hidden chunk
            pl.BlockSpec((1, th), lambda i, j: (0, j)),     # b1 hidden chunk
            pl.BlockSpec((th, Cout), lambda i, j: (j, 0)),  # w2 hidden chunk
            pl.BlockSpec((1, Cout), lambda i, j: (0, 0)),   # b2
        ]
        out_specs = pl.BlockSpec((tm, Cout), lambda i, j: (i, 0))
        dim_sem = ("parallel", "arbitrary")

    out = pl.pallas_call(
        kernel,
        out_shape=jax.ShapeDtypeStruct((M, Cout), jnp.float32),
        grid_spec=pltpu.PrefetchScalarGridSpec(
            num_scalar_prefetch=0,
            grid=grid,
            in_specs=in_specs,
            out_specs=out_specs,
        ),
        compiler_params=pltpu.CompilerParams(
            dimension_semantics=dim_sem,
            vmem_limit_bytes=vmem_limit_bytes),
    )(x2, w1_bf16, b1_f32, w2_bf16, b2_f32)

    return out.reshape(lead + (Cout,))


# ----------------------------------------------------------------------------------
# Pure-JAX reference (f32, exact erf GELU) for a sanity check.
# ----------------------------------------------------------------------------------
def _mlp_reference(x, w1_t, b1, w2_t, b2):
    h = jnp.dot(x, w1_t) + b1
    h = jax.nn.gelu(h, approximate=False)
    return jnp.dot(h, w2_t) + b2


if __name__ == "__main__":
    # Small but lane-dense shapes: in_features=128, hidden=512, 2*64 = 128 rows.
    B, L, C, Hd = 2, 64, 128, 512

    key = jax.random.PRNGKey(0)
    kx, k1, k2, k3, k4 = jax.random.split(key, 5)
    x = jax.random.normal(kx, (B, L, C), jnp.float32)
    w1_t = 0.05 * jax.random.normal(k1, (C, Hd), jnp.float32)   # fc1 weight^T
    b1 = 0.05 * jax.random.normal(k2, (Hd,), jnp.float32)
    w2_t = 0.05 * jax.random.normal(k3, (Hd, C), jnp.float32)   # fc2 weight^T
    b2 = 0.05 * jax.random.normal(k4, (C,), jnp.float32)

    # Convert weights to bf16 ONCE (what the review asks callers to do), keep f32 for ref.
    w1_bf16 = w1_t.astype(jnp.bfloat16)
    w2_bf16 = w2_t.astype(jnp.bfloat16)

    out = mlp(x, w1_bf16, b1, w2_bf16, b2)
    out = jax.block_until_ready(out)

    assert out.shape == (B, L, C)
    assert bool(jnp.all(jnp.isfinite(out)))

    ref = _mlp_reference(x, w1_t, b1, w2_t, b2)
    max_err = float(jnp.max(jnp.abs(out - ref)))
    # bf16 matmul operands + tanh-approx GELU vs exact erf -> loose tolerance
    assert max_err < 0.08, f"max abs error vs reference: {max_err}"

    print("KERNEL_OK")
</pallas_src>

<mosaic_0001>
module attributes {stable_mosaic.version = 11 : i64} {
  func.func @_mlp_kernel_resident(%arg0: i32, %arg1: memref<64x128xbf16, #tpu.memory_space<vmem>>, %arg2: memref<128x512xbf16, #tpu.memory_space<vmem>>, %arg3: memref<1x512xf32, #tpu.memory_space<vmem>>, %arg4: memref<512x128xbf16, #tpu.memory_space<vmem>>, %arg5: memref<1x128xf32, #tpu.memory_space<vmem>>, %arg6: memref<64x128xf32, #tpu.memory_space<vmem>>) attributes {dimension_semantics = [#tpu.dimension_semantics<parallel>], iteration_bounds = array<i64: 2>, scalar_prefetch = 0 : i64, scratch_operands = 0 : i64, tpu.core_type = #tpu.core_type<tc>, window_params = [{transform_indices = @transform_0, window_bounds = array<i64: 64, 128>}, {pipeline_mode = #tpu.pipeline_mode<synchronous>, transform_indices = @transform_1, window_bounds = array<i64: 128, 512>}, {pipeline_mode = #tpu.pipeline_mode<synchronous>, transform_indices = @transform_2, window_bounds = array<i64: 1, 512>}, {pipeline_mode = #tpu.pipeline_mode<synchronous>, transform_indices = @transform_3, window_bounds = array<i64: 512, 128>}, {pipeline_mode = #tpu.pipeline_mode<synchronous>, transform_indices = @transform_4, window_bounds = array<i64: 1, 128>}, {transform_indices = @transform_5, window_bounds = array<i64: 64, 128>}]} {
    %c0 = arith.constant 0 : index
    %c0_0 = arith.constant 0 : index
    %0 = vector.load %arg1[%c0, %c0_0] : memref<64x128xbf16, #tpu.memory_space<vmem>>, vector<64x128xbf16>
    %c0_1 = arith.constant 0 : index
    %c0_2 = arith.constant 0 : index
    %1 = vector.load %arg2[%c0_1, %c0_2] : memref<128x512xbf16, #tpu.memory_space<vmem>>, vector<128x512xbf16>
    %cst = arith.constant dense<0.000000e+00> : vector<64x512xf32>
    %2 = tpu.matmul %0, %1, %cst {dimension_numbers = #tpu.dot_dimension_numbers<[1], [0], [0], [1], [0, 0, 1, 1], [], []>} : vector<64x128xbf16>, vector<128x512xbf16>, vector<64x512xf32> -> vector<64x512xf32>
    %c0_3 = arith.constant 0 : index
    %c0_4 = arith.constant 0 : index
    %3 = vector.load %arg3[%c0_3, %c0_4] : memref<1x512xf32, #tpu.memory_space<vmem>>, vector<1x512xf32>
    %4 = vector.broadcast %3 : vector<1x512xf32> to vector<64x512xf32>
    %5 = arith.addf %2, %4 : vector<64x512xf32>
    %6 = arith.mulf %5, %5 : vector<64x512xf32>
    %7 = arith.mulf %6, %5 : vector<64x512xf32>
    %cst_5 = arith.constant 5.000000e-01 : f32
    %8 = vector.broadcast %cst_5 : f32 to vector<64x512xf32>
    %9 = arith.mulf %8, %5 : vector<64x512xf32>
    %cst_6 = arith.constant 4.471500e-02 : f32
    %10 = vector.broadcast %cst_6 : f32 to vector<64x512xf32>
    %11 = arith.mulf %10, %7 : vector<64x512xf32>
    %12 = arith.addf %5, %11 : vector<64x512xf32>
    %cst_7 = arith.constant 0.797884583 : f32
    %13 = vector.broadcast %cst_7 : f32 to vector<64x512xf32>
    %14 = arith.mulf %13, %12 : vector<64x512xf32>
    %15 = math.tanh %14 : vector<64x512xf32>
    %cst_8 = arith.constant 1.000000e+00 : f32
    %16 = vector.broadcast %cst_8 : f32 to vector<64x512xf32>
    %17 = arith.addf %16, %15 : vector<64x512xf32>
    %18 = arith.mulf %9, %17 : vector<64x512xf32>
    %19 = arith.truncf %18 : vector<64x512xf32> to vector<64x512xbf16>
    %c0_9 = arith.constant 0 : index
    %c0_10 = arith.constant 0 : index
    %20 = vector.load %arg4[%c0_9, %c0_10] : memref<512x128xbf16, #tpu.memory_space<vmem>>, vector<512x128xbf16>
    %cst_11 = arith.constant dense<0.000000e+00> : vector<64x128xf32>
    %21 = tpu.matmul %19, %20, %cst_11 {dimension_numbers = #tpu.dot_dimension_numbers<[1], [0], [0], [1], [0, 0, 1, 1], [], []>} : vector<64x512xbf16>, vector<512x128xbf16>, vector<64x128xf32> -> vector<64x128xf32>
    %c0_12 = arith.constant 0 : index
    %c0_13 = arith.constant 0 : index
    %22 = vector.load %arg5[%c0_12, %c0_13] : memref<1x128xf32, #tpu.memory_space<vmem>>, vector<1x128xf32>
    %23 = vector.broadcast %22 : vector<1x128xf32> to vector<64x128xf32>
    %24 = arith.addf %21, %23 : vector<64x128xf32>
    %c0_14 = arith.constant 0 : index
    %c0_15 = arith.constant 0 : index
    %25 = vector.load %arg6[%c0_14, %c0_15] : memref<64x128xf32, #tpu.memory_space<vmem>>, vector<64x128xf32>
    tpu.vector_store %arg6[%c0_14, %c0_15], %24 {strides = array<i32>} : memref<64x128xf32, #tpu.memory_space<vmem>>, vector<64x128xf32>,
    return
  }
  func.func @transform_0(%arg0: i32) -> (i32, i32) {
    %c0_i32 = arith.constant 0 : i32
    %c0_i32_0 = arith.constant 0 : i32
    return %arg0, %c0_i32 : i32, i32
  }
  func.func @transform_1(%arg0: i32) -> (i32, i32) {
    %c0_i32 = arith.constant 0 : i32
    %c0_i32_0 = arith.constant 0 : i32
    %c0_i32_1 = arith.constant 0 : i32
    return %c0_i32, %c0_i32_0 : i32, i32
  }
  func.func @transform_2(%arg0: i32) -> (i32, i32) {
    %c0_i32 = arith.constant 0 : i32
    %c0_i32_0 = arith.constant 0 : i32
    %c0_i32_1 = arith.constant 0 : i32
    return %c0_i32, %c0_i32_0 : i32, i32
  }
  func.func @transform_3(%arg0: i32) -> (i32, i32) {
    %c0_i32 = arith.constant 0 : i32
    %c0_i32_0 = arith.constant 0 : i32
    %c0_i32_1 = arith.constant 0 : i32
    return %c0_i32, %c0_i32_0 : i32, i32
  }
  func.func @transform_4(%arg0: i32) -> (i32, i32) {
    %c0_i32 = arith.constant 0 : i32
    %c0_i32_0 = arith.constant 0 : i32
    %c0_i32_1 = arith.constant 0 : i32
    return %c0_i32, %c0_i32_0 : i32, i32
  }
  func.func @transform_5(%arg0: i32) -> (i32, i32) {
    %c0_i32 = arith.constant 0 : i32
    %c0_i32_0 = arith.constant 0 : i32
    return %arg0, %c0_i32 : i32, i32
  }
}

</mosaic_0001>

<bundles_post_ra>
// kernel: tpu_custom_call.1
= control target key start
LH: loop header
LB: loop body
LE: loop exit
PB: predicated region body
PF: predicated region fallthrough
CT: control target
= control target key end

     0   :  { %10 = vsyncpa [#allocation3], 0  ;;  %s2724_s0 = inlined_call_operand.hbm [shape: bf16[128,128], index: 0, kind: input, shape index: {}]   ;;  %s2725_s1 = inlined_call_operand.hbm [shape: bf16[128,512], index: 1, kind: input, shape index: {}]   ;;  %s2726_s2 = inlined_call_operand.vmem [shape: f32[1,512], index: 2, kind: input, shape index: {}]   ;;  %s2727_s3 = inlined_call_operand.hbm [shape: bf16[512,128], index: 3, kind: input, shape index: {}]   ;;  %s2728_s4 = inlined_call_operand.vmem [shape: f32[1,128], index: 4, kind: input, shape index: {}]   ;;  %s2729_s5 = inlined_call_operand.hbm [shape: f32[128,128], index: 5, kind: output, shape index: {}]  }
   0x1   :  { %12 = vsyncpa [#allocation3 + $0x1], 0 }
   0x2   :  { %13 = vsyncpa [#allocation6], 0 }
   0x3   :  { %14 = vsyncpa [#allocation4], 0 }
   0x4   :  { %16 = vsyncpa [#allocation4 + $0x1], 0  ;;  %s2068_s18 = smov 0   ;;  %s2070_s19 = smov 0  }
   0x5   :  { %s2072_s20 = smov 0   ;;  %s2074_s21 = smov 0  }
   0x6 LB: > { %s2089_s22 = sadd.s32 4294967295, %s2025_s21   ;;  %s1478_s23 = sadd.s32 4294967294, %s2025_s21   ;;  %s2025_s21 = sphi %s2074_s21, %s2758_s21   ;;  %s2021_s20 = sphi %s2072_s20, %s2757_s20   ;;  %s2017_s19 = sphi %s2070_s19, %s2756_s19   ;;  %s2013_s18 = sphi %s2068_s18, %s2755_s18  }
   0x7   : > { %p42_p0 = scmp.ne.s32.totalorder %s2017_s19, %s2013_s18  ;;  %p2730_p1 = scmp.eq.s32.totalorder %s2089_s22, 0 }
   0x8   : > { %p156_p3 = scmp.eq.s32.totalorder %s1478_s23, 1  ;;  %p1479_p5 = scmp.ge.s32.totalorder %s2025_s21, 1 }
   0x9   : > { %p2098_p4 = por %p2730_p1, %p42_p0  ;;  %p163_p7 = scmp.lt.s32.totalorder %s2025_s21, 3 }
   0xa   : > { %p2103_p6 = por %p156_p3, %p42_p0  ;;  %s2027_s27 = smov [#allocation5]  }
   0xb   : > { %s2736_s24 = scalar_select %p2098_p4, 1, 0 }
   0xc   : > { %s2737_s25 = scalar_select %p2103_p6, 1, 0 }
   0xd   : > { %p2108_p8 = pnand %p1479_p5, %p163_p7  ;;  %s175_s28 = sshll.u32 %s2027_s27, 4  ;;  %s2112_s28 = int_to_ptr.vmem [resolvable:$true] %s175_s28 }
   0xe   : > { %s2028_s30 = smov [#allocation7]   ;;  %s1869_s9 = scalar_lea.hbm %s2725_s1, 4096 }
   0xf   : > { %p1659_p9 = pneg %p2108_p8  ;;  %s191_s6 = sshll.u32 %s2028_s30, 4  ;;  %s2123_s6 = int_to_ptr.vmem [resolvable:$true] %s191_s6 }
  0x10   : > { %p1870_p12 = scmp.ne.s32.totalorder %s2725_s1, %s1869_s9  ;;  %p1876_p5 = scmp.lt.u32.totalorder %s1869_s9, %s2725_s1 }
  0x11   : > { %p2119_p11 = pnand %p1659_p9, %p2730_p1 }
  0x13   : > { %p1871_p13 = pneg %p2119_p11 }
  0x15   : > { %p1872_p0 = pnand %p1871_p13, %p1870_p12 }
  0x17   : > { %p1873_p3 = pneg %p1872_p0 }
  0x19   : > { %p1878_p7 = pnand %p1876_p5, %p1873_p3 }
  0x1b   : > { %1881 = shalt.err (!%p1878_p7)
}
  0x1c   : > { %s1882_s14 = scalar_lea.vmem %s2112_s28, 4096  ;;  %p1890_p2 = scmp.lt.s32.totalorder %s2112_s28, %s2112_s28 }
  0x1d   : > { %p1883_p9 = scmp.ne.s32.totalorder %s2112_s28, %s1882_s14  ;;  %p1891_p12 = scmp.lt.s32.totalorder %s1882_s14, %s1882_s14 }
  0x1f   : > { %p1885_p10 = pnand %p1883_p9, %p1871_p13  ;;  %p1892_p0 = por %p1891_p12, %p1890_p2 }
  0x21   : > { %p1886_p1 = pneg %p1885_p10 }
  0x23   : > { %p1893_p6 = pnand %p1892_p0, %p1886_p1 }
  0x25   : > { %1896 = shalt.err (!%p1893_p6)
}
  0x26   : > { %s2029_s15 = smov 256   ;;  %s2030_s16 = smov 16  }
  0x27   : > { %1662 = dma.hbm_to_vmem [thread:$0]  (!%p2119_p11), %s2725_s1, 4096, %s2112_s28, [#allocation6], %s2029_s15, %s2029_s15, %s2030_s16  }
  0x28   : > { %s1897_s7 = scalar_lea.hbm %s2727_s3, 4096 }
  0x29   : > { %p1898_p2 = scmp.ne.s32.totalorder %s2727_s3, %s1897_s7  ;;  %p1904_p10 = scmp.lt.u32.totalorder %s1897_s7, %s2727_s3 }
  0x2b   : > { %p1900_p1 = pnand %p1898_p2, %p1871_p13 }
  0x2d   : > { %p1901_p6 = pneg %p1900_p1 }
  0x2f   : > { %p1906_p3 = pnand %p1904_p10, %p1901_p6 }
  0x31   : > { %1909 = shalt.err (!%p1906_p3)
}
  0x32   : > { %s1910_s28 = scalar_lea.vmem %s2123_s6, 4096  ;;  %p1918_p12 = scmp.lt.s32.totalorder %s2123_s6, %s2123_s6 }
  0x33   : > { %p1911_p5 = scmp.ne.s32.totalorder %s2123_s6, %s1910_s28  ;;  %p1919_p0 = scmp.lt.s32.totalorder %s1910_s28, %s1910_s28 }
  0x35   : > { %p1913_p7 = pnand %p1911_p5, %p1871_p13  ;;  %p1920_p2 = por %p1919_p0, %p1918_p12 }
  0x37   : > { %p1914_p9 = pneg %p1913_p7 }
  0x39   : > { %p1921_p1 = pnand %p1920_p2, %p1914_p9 }
  0x3b   : > { %1924 = shalt.err (!%p1921_p1)
}
  0x3c   : > { %s2031_s12 = smov 64   ;;  %s2032_s13 = smov 4  }
  0x3d   : > { %1665 = dma.hbm_to_vmem [thread:$0]  (!%p2119_p11), %s2727_s3, 4096, %s2123_s6, [#allocation6], %s2031_s12, %s2031_s12, %s2032_s13  }
  0x3e   : > { %s2181_s16 = sadd.s32 1, %s2025_s21   ;;  %s29_s23 = sadd.s32 1, %s2021_s20 }
  0x3f   : > { %s26_s17 = ssub.s32 %s2025_s21, %s2181_s16  ;;  %p36_p6 = scmp.ne.s32.totalorder %s2021_s20, %s2017_s19 }
  0x40   : > { %p27_p13 = scmp.eq.s32.totalorder %s26_s17, 0  ;;  %p37_p10 = scmp.eq.s32.totalorder %s2025_s21, 0 }
  0x41   : > { %p2740_p5 = scmp.eq.s32.totalorder %s2089_s22, 1  ;;  %p1676_p9 = scmp.lt.s32.totalorder %s2025_s21, 2 }
  0x42   : > { %s2190_s27 = scalar_select %p27_p13, %s2021_s20, %s29_s23  }
  0x43   : > { %p38_p3 = por %p37_p10, %p36_p6  ;;  %p2194_p7 = por %p2740_p5, %p36_p6 }
  0x44   : > { %s208_s30 = sand.u32 1, %s2021_s20   ;;  %s1565_s6 = sshll.u32 %s2025_s21, 9 }
  0x45   : > { %s2741_s29 = scalar_select %p2194_p7, 1, 0 }
  0x46   : > { %s1483_s7 = sshll.u32 %s208_s30, 5  ;;  %s2204_s10 = scalar_lea.hbm %s2724_s0, %s1565_s6 }
  0x47   : > { %s212_s11 = scalar_lea.vmem [#allocation2], %s1483_s7  ;;  %p2208_p11 = pnand %p1676_p9, %p38_p3 }
  0x48   : > { %s219_s28 = sshll.u32 %s212_s11, 4  ;;  %s2212_s15 = scalar_lea.sflag [#allocation3], %s208_s30  ;;  %s2206_s28 = int_to_ptr.vmem [resolvable:$true] %s219_s28 }
  0x49   : > { %s1925_s17 = scalar_lea.hbm %s2204_s10, 512  ;;  %p1927_p0 = pneg %p2208_p11 }
  0x4a   : > { %p1926_p12 = scmp.ne.s32.totalorder %s2204_s10, %s1925_s17  ;;  %s1930_s6 = scalar_lea.hbm %s2724_s0, 1024 }
  0x4b   : > { %p1931_p13 = scmp.lt.u32.totalorder %s2204_s10, %s2724_s0  ;;  %p1932_p6 = scmp.lt.u32.totalorder %s1930_s6, %s1925_s17 }
  0x4c   : > { %p1928_p2 = pnand %p1927_p0, %p1926_p12  ;;  %p1934_p3 = scmp.lt.u32.totalorder %s1925_s17, %s2204_s10 }
  0x4d   : > { %p1933_p10 = por %p1932_p6, %p1931_p13 }
  0x4e   : > { %p1929_p1 = pneg %p1928_p2 }
  0x4f   : > { %p1935_p5 = por %p1934_p3, %p1933_p10 }
  0x51   : > { %p1936_p9 = pnand %p1935_p5, %p1929_p1 }
  0x53   : > { %1939 = shalt.err (!%p1936_p9)
}
  0x54   : > { %s1940_s30 = scalar_lea.vmem %s2206_s28, 512  ;;  %s2033_s11 = smov [#allocation2]  }
  0x55   : > { %p1941_p12 = scmp.ne.s32.totalorder %s2206_s28, %s1940_s30  ;;  %s1945_s23 = sshll.u32 %s2033_s11, 4  ;;  %s1946_s23 = int_to_ptr.vmem [resolvable:$false] %s1945_s23 }
  0x56   : > { %s1947_s7 = scalar_lea.vmem %s1946_s23, 1024  ;;  %p1948_p4 = scmp.lt.s32.totalorder %s2206_s28, %s1946_s23 }
  0x57   : > { %p1943_p2 = pnand %p1941_p12, %p1927_p0  ;;  %p1949_p13 = scmp.lt.s32.totalorder %s1947_s7, %s1940_s30 }
  0x59   : > { %p1944_p7 = pneg %p1943_p2  ;;  %p1950_p6 = por %p1949_p13, %p1948_p4 }
  0x5b   : > { %p1951_p10 = pnand %p1950_p6, %p1944_p7 }
  0x5d   : > { %1954 = shalt.err (!%p1951_p10)
}
  0x5e   : > { %1669 = dma.hbm_to_vmem [thread:$0]  (!%p2208_p11), %s2204_s10, 512, %s2206_s28, %s2212_s15, %s2031_s12, %s2031_s12, %s2032_s13  }
  0x5f   : > { %231 = sbr.rel (%p2108_p8) target bundleno = 681 (0x2a9), region = 40 }
  0x66   : > { %s2246_s17 = sand.u32 1, %s2017_s19   ;;  %p2743_p4 = scmp.ne.s32.totalorder %s2736_s24, 0 }
  0x67   : > { %s1487_s6 = sshll.u32 %s2246_s17, 5  ;;  %s234_s8 = scalar_lea.sflag [#allocation3], %s2246_s17 }
  0x68   : > { %s2250_s9 = scalar_lea.vmem [#allocation2], %s1487_s6 }
  0x69   : > { %2000 = dma.done.wait (%p2743_p4), %s234_s8, 512  }
  0x6a   : > { %2002 = vsyncadd (%p2743_p4), %s234_s8, 4294966784  ;;  %p2744_p7 = scmp.eq.s32.totalorder %s2089_s22, 0 }
  0x6c   : > { %2004 = dma.done.wait (%p2744_p7), [#allocation6], 8192   ;;  %p2745_p8 = pmov %p2744_p7 }
  0x6d   : > { %v2034_v0 = vmov 0   ;;  %v1721_v1 = vld [vmem:[#allocation5 + $0x4] ss:$16 sps:$4 sm:$0xff]   ;;  %v1723_v2 = vld [vmem:[#allocation5 + $0xc] ss:$16 sps:$4 sm:$0xff]   ;;  %s1490_s10 = sshll.u32 %s2246_s17, 6 }
  0x6e   : > { %2006 = vsyncadd (%p2745_p8), [#allocation6], 4294959104  ;;  %553 = vmatprep.mubr.bf16.mxu0 %v2034_v0  ;;  %626 = vmatprep.mubr.bf16.mxu1 %v2034_v0  ;;  %v1725_v3 = vld [vmem:[#allocation5] ss:$16 sps:$4 sm:$0xff]   ;;  %v1726_v4 = vld [vmem:[#allocation5 + $0x8] ss:$16 sps:$4 sm:$0xff]  }
  0x6f   : > { %521 = vmatprep.subr.bf16.mxu0 %v1721_v1  ;;  %594 = vmatprep.subr.bf16.mxu1 %v1723_v2  ;;  %v1727_v5 = vld [vmem:[#allocation5 + $0x24] ss:$16 sps:$4 sm:$0xff]   ;;  %v1729_v6 = vld [vmem:[#allocation5 + $0x2c] ss:$16 sps:$4 sm:$0xff]   ;;  %v1731_v7 = vld [vmem:[#allocation5 + $0x20] ss:$16 sps:$4 sm:$0xff]  }
  0x70   : > { %522 = vmatpush1.bf16.msra.mxu0 %v1725_v3  ;;  %595 = vmatpush1.bf16.msra.mxu1 %v1726_v4  ;;  %v1732_v8 = vld [vmem:[#allocation5 + $0x28] ss:$16 sps:$4 sm:$0xff]   ;;  %v1733_v9 = vld [vmem:[#allocation5 + $0x44] ss:$16 sps:$4 sm:$0xff]   ;;  %v1735_v10 = vld [vmem:[#allocation5 + $0x4c] ss:$16 sps:$4 sm:$0xff]  }
  0x71   : > { %523 = vmatprep.subr.bf16.mxu0 %v1727_v5  ;;  %596 = vmatprep.subr.bf16.mxu1 %v1729_v6  ;;  %v1737_v11 = vld [vmem:[#allocation5 + $0x40] ss:$16 sps:$4 sm:$0xff]   ;;  %v1738_v12 = vld [vmem:[#allocation5 + $0x48] ss:$16 sps:$4 sm:$0xff]   ;;  %v1739_v13 = vld [vmem:[#allocation5 + $0x64] ss:$16 sps:$4 sm:$0xff]   ;;  %v317_v5 = vlaneseq }
  0x72   : > { %v1741_v14 = vld [vmem:[#allocation5 + $0x6c] ss:$16 sps:$4 sm:$0xff]   ;;  %v1743_v15 = vld [vmem:[#allocation5 + $0x60] ss:$16 sps:$4 sm:$0xff]   ;;  %v1744_v16 = vld [vmem:[#allocation5 + $0x68] ss:$16 sps:$4 sm:$0xff]  }
  0x73   : > { %v1745_v17 = vld [vmem:[#allocation5 + $0x84] ss:$16 sps:$4 sm:$0xff]   ;;  %v1747_v18 = vld [vmem:[#allocation5 + $0x8c] ss:$16 sps:$4 sm:$0xff]   ;;  %v1749_v19 = vld [vmem:[#allocation5 + $0x80] ss:$16 sps:$4 sm:$0xff]  }
  0x74   : > { %524 = vmatpush1.bf16.msra.mxu0 %v1731_v7  ;;  %597 = vmatpush1.bf16.msra.mxu1 %v1732_v8  ;;  %v1750_v20 = vld [vmem:[#allocation5 + $0x88] ss:$16 sps:$4 sm:$0xff]   ;;  %v1751_v21 = vld [vmem:[#allocation5 + $0xa4] ss:$16 sps:$4 sm:$0xff]   ;;  %v1753_v22 = vld [vmem:[#allocation5 + $0xac] ss:$16 sps:$4 sm:$0xff]  }
  0x75   : > { %525 = vmatprep.subr.bf16.mxu0 %v1733_v9  ;;  %598 = vmatprep.subr.bf16.mxu1 %v1735_v10  ;;  %v1755_v23 = vld [vmem:[#allocation5 + $0xa0] ss:$16 sps:$4 sm:$0xff]   ;;  %v1756_v24 = vld [vmem:[#allocation5 + $0xa8] ss:$16 sps:$4 sm:$0xff]   ;;  %v1757_v25 = vld [vmem:[#allocation5 + $0xc4] ss:$16 sps:$4 sm:$0xff]  }
  0x76   : > { %v1759_v26 = vld [vmem:[#allocation5 + $0xcc] ss:$16 sps:$4 sm:$0xff]   ;;  %v1761_v27 = vld [vmem:[#allocation5 + $0xc0] ss:$16 sps:$4 sm:$0xff]   ;;  %v1762_v28 = vld [vmem:[#allocation5 + $0xc8] ss:$16 sps:$4 sm:$0xff]  }
  0x77   : > { %v1763_v29 = vld [vmem:[#allocation5 + $0xe4] ss:$16 sps:$4 sm:$0xff]   ;;  %v1765_v30 = vld [vmem:[#allocation5 + $0xec] ss:$16 sps:$4 sm:$0xff]   ;;  %v1767_v31 = vld [vmem:[#allocation5 + $0xe0] ss:$16 sps:$4 sm:$0xff]  }
  0x78   : > { %526 = vmatpush1.bf16.msra.mxu0 %v1737_v11  ;;  %599 = vmatpush1.bf16.msra.mxu1 %v1738_v12  ;;  %v1768_v32 = vld [vmem:[#allocation5 + $0xe8] ss:$16 sps:$4 sm:$0xff]   ;;  %v1769_v33 = vld [vmem:[%s2250_s9] sm:$0xff]   ;;  %v1771_v35 = vld [vmem:[%s2250_s9 + $0x10] sm:$0xff]   ;;  %v318_v6 = vshrl.u32 %v317_v5, 7  ;;  %s2657_s28 = scalar_lea.vmem [#allocation8], %s1490_s10 }
  0x79   : > { %527 = vmatprep.subr.bf16.mxu0 %v1739_v13  ;;  %600 = vmatprep.subr.bf16.mxu1 %v1741_v14  ;;  %v1770_v34 = vld [vmem:[%s2250_s9 + $0x8] sm:$0xff]   ;;  %v1772_v36 = vld [vmem:[%s2250_s9 + $0x18] sm:$0xff]   ;;  %v1773_v37 = vld [vmem:[#allocation7 + $0x40] sm:$0xff]   ;;  %s1386_s14 = sshll.u32 %s2657_s28, 4  ;;  %s1566_s15 = sshll.u32 %s2089_s22, 10  ;;  %s2673_s14 = int_to_ptr.vmem [resolvable:$true] %s1386_s14 }
  0x7a   : > { %v1775_v38 = vld [vmem:[#allocation7 + $0xc0] sm:$0xff]   ;;  %v1777_v41 = vld [vmem:[#allocation7 + $0x48] sm:$0xff]   ;;  %v1781_v45 = vld [vmem:[#allocation7 + $0x50] sm:$0xff]   ;;  %v319_v7 = vsub.s32 0, %v318_v6  ;;  %v327_v8 = vsub.s32 2, %v318_v6  ;;  %v323_v10 = vsub.s32 1, %v318_v6  ;;  %s2678_s23 = scalar_lea.hbm %s2729_s5, %s1566_s15 }
  0x7b   : > { %v1774_v39 = vld [vmem:[#allocation7] sm:$0xff]   ;;  %v1779_v42 = vld [vmem:[#allocation7 + $0xc8] sm:$0xff]   ;;  %v1783_v46 = vld [vmem:[#allocation7 + $0xd0] sm:$0xff]   ;;  %v331_v11 = vsub.s32 3, %v318_v6  ;;  %s1373_s7 = scalar_lea.sflag [#allocation4], %s2246_s17  ;;  %s1955_s22 = scalar_lea.vmem %s2673_s14, 1024 }
  0x7c   : > { %528 = vmatpush1.bf16.msra.mxu0 %v1743_v15  ;;  %601 = vmatpush1.bf16.msra.mxu1 %v1744_v16  ;;  %v1776_v40 = vld [vmem:[#allocation7 + $0x80] sm:$0xff]   ;;  %v1778_v43 = vld [vmem:[#allocation7 + $0x8] sm:$0xff]   ;;  %v1782_v47 = vld [vmem:[#allocation7 + $0x10] sm:$0xff]   ;;  %p1956_p11 = scmp.ne.s32.totalorder %s2673_s14, %s1955_s22  ;;  %p2752_p0 = scmp.ne.s32.totalorder %s2741_s29, 0 }
  0x7d   : > { %529 = vmatprep.subr.bf16.mxu0 %v1745_v17  ;;  %602 = vmatprep.subr.bf16.mxu1 %v1747_v18  ;;  %v1780_v44 = vld [vmem:[#allocation7 + $0x88] sm:$0xff]   ;;  %v1784_v48 = vld [vmem:[#allocation7 + $0x90] sm:$0xff]   ;;  %v1785_v49 = vld [vmem:[#allocation7 + $0x58] sm:$0xff]   ;;  %s2035_s6 = smov [#allocation8]  }
  0x7e   : > { %v1787_v50 = vld [vmem:[#allocation7 + $0xd8] sm:$0xff]   ;;  %v1789_v53 = vld [vmem:[#allocation7 + $0x60] sm:$0xff]   ;;  %v1793_v57 = vld [vmem:[#allocation7 + $0x68] sm:$0xff]   ;;  %p1957_p1 = pnand %p1956_p11, %p2752_p0  ;;  %s1959_s8 = sshll.u32 %s2035_s6, 4  ;;  %s1960_s8 = int_to_ptr.vmem [resolvable:$false] %s1959_s8 }
  0x7f   : > { %v1786_v51 = vld [vmem:[#allocation7 + $0x18] sm:$0xff]   ;;  %v1791_v54 = vld [vmem:[#allocation7 + $0xe0] sm:$0xff]   ;;  %v1795_v58 = vld [vmem:[#allocation7 + $0xe8] sm:$0xff]   ;;  %s1961_s9 = scalar_lea.vmem %s1960_s8, 2048  ;;  %p1962_p5 = scmp.lt.s32.totalorder %s2673_s14, %s1960_s8 }
  0x80   : > { %530 = vmatpush1.bf16.msra.mxu0 %v1749_v19  ;;  %603 = vmatpush1.bf16.msra.mxu1 %v1750_v20  ;;  %v1788_v52 = vld [vmem:[#allocation7 + $0x98] sm:$0xff]   ;;  %v1790_v55 = vld [vmem:[#allocation7 + $0x20] sm:$0xff]   ;;  %v1794_v59 = vld [vmem:[#allocation7 + $0x28] sm:$0xff]   ;;  %p1958_p3 = pneg %p1957_p1  ;;  %p1963_p9 = scmp.lt.s32.totalorder %s1961_s9, %s1955_s22 }
  0x81   : > { %531 = vmatprep.subr.bf16.mxu0 %v1751_v21  ;;  %604 = vmatprep.subr.bf16.mxu1 %v1753_v22  ;;  %v1792_v56 = vld [vmem:[#allocation7 + $0xa0] sm:$0xff]   ;;  %v1796_v60 = vld [vmem:[#allocation7 + $0xa8] sm:$0xff]   ;;  %v1797_v61 = vld [vmem:[#allocation7 + $0x70] sm:$0xff]  }
  0x82   : > { %v1799_v62 = vld [vmem:[#allocation7 + $0xf0] sm:$0xff]   ;;  %v1801_v1 = vld [vmem:[#allocation7 + $0x78] sm:$0xff]   ;;  %v315_v9 = vld [vmem:[%s2726_s2] sm:$0xf]  ;;  %p1964_p12 = por %p1963_p9, %p1962_p5 }
  0x83   : > { %v1798_v63 = vld [vmem:[#allocation7 + $0x30] sm:$0xff]   ;;  %v1803_v2 = vld [vmem:[#allocation7 + $0xf8] sm:$0xff]   ;;  %v2275_v12 = vrot.slane %v315_v9, %v319_v7  ;;  %v2277_v13 = vrot.slane %v315_v9, %v327_v8  ;;  %v2279_v14 = vrot.slane %v315_v9, %v323_v10  ;;  %v2281_v15 = vrot.slane %v315_v9, %v331_v11 }
  0x84   : > { %532 = vmatpush1.bf16.msra.mxu0 %v1755_v23  ;;  %605 = vmatpush1.bf16.msra.mxu1 %v1756_v24  ;;  %v1802_v3 = vld [vmem:[#allocation7 + $0x38] sm:$0xff]   ;;  %p1965_p2 = pnand %p1964_p12, %p1958_p3 }
  0x85   : > { %533 = vmatprep.subr.bf16.mxu0 %v1757_v25  ;;  %606 = vmatprep.subr.bf16.mxu1 %v1759_v26  ;;  %v1804_v4 = vld [vmem:[#allocation7 + $0xb8] sm:$0xff]  }
  0x88   : > { %534 = vmatpush1.bf16.msra.mxu0 %v1761_v27  ;;  %607 = vmatpush1.bf16.msra.mxu1 %v1762_v28 }
  0x89   : > { %535 = vmatprep.subr.bf16.mxu0 %v1763_v29  ;;  %608 = vmatprep.subr.bf16.mxu1 %v1765_v30 }
  0x8c   : > { %536 = vmatpush1.bf16.msra.mxu0 %v1767_v31  ;;  %609 = vmatpush1.bf16.msra.mxu1 %v1768_v32 }
  0x8d   : > { %1567 = vmatprep.subr.bf16.mxu0 %v1773_v37  ;;  %1607 = vmatprep.subr.bf16.mxu1 %v1775_v38 }
  0x8f   : > { %554 = vmatmul.mubr.bf16.vlgmr.msra.gmra.mrb[0].mxu0 %v1769_v33  ;;  %627 = vmatmul.mubr.bf16.vlgmr.msra.gmra.mrb[0].mxu1 %v1769_v33 }
  0x90   : > { %563 = vmatprep.mubr.bf16.mxu0 %v2034_v0  ;;  %636 = vmatprep.mubr.bf16.mxu1 %v2034_v0 }
  0x91   : > { %1568 = vmatpush3.bf16.msra.mxu0 %v1774_v39  ;;  %1608 = vmatpush3.bf16.msra.mxu1 %v1776_v40 }
  0x92   : > { %1569 = vmatprep.subr.bf16.mxu0 %v1777_v41  ;;  %1609 = vmatprep.subr.bf16.mxu1 %v1779_v42 }
  0x95   : > { %1570 = vmatpush3.bf16.msra.mxu0 %v1778_v43  ;;  %1610 = vmatpush3.bf16.msra.mxu1 %v1780_v44 }
  0x96   : > { %1571 = vmatprep.subr.bf16.mxu0 %v1781_v45  ;;  %1611 = vmatprep.subr.bf16.mxu1 %v1783_v46 }
  0x97   : > { %564 = vmatmul.mubr.bf16.gmra.mrb[4].mxu0 %v1770_v34  ;;  %637 = vmatmul.mubr.bf16.gmra.mrb[4].mxu1 %v1770_v34 }
  0x98   : > { %573 = vmatprep.mubr.bf16.mxu0 %v2034_v0  ;;  %646 = vmatprep.mubr.bf16.mxu1 %v2034_v0 }
  0x99   : > { %1572 = vmatpush3.bf16.msra.mxu0 %v1782_v47  ;;  %1612 = vmatpush3.bf16.msra.mxu1 %v1784_v48 }
  0x9a   : > { %1573 = vmatprep.subr.bf16.mxu0 %v1785_v49  ;;  %1613 = vmatprep.subr.bf16.mxu1 %v1787_v50 }
  0x9d   : > { %1574 = vmatpush3.bf16.msra.mxu0 %v1786_v51  ;;  %1614 = vmatpush3.bf16.msra.mxu1 %v1788_v52 }
  0x9e   : > { %1575 = vmatprep.subr.bf16.mxu0 %v1789_v53  ;;  %1615 = vmatprep.subr.bf16.mxu1 %v1791_v54 }
  0x9f   : > { %574 = vmatmul.mubr.bf16.gmra.mrb[8].mxu0 %v1771_v35  ;;  %647 = vmatmul.mubr.bf16.gmra.mrb[8].mxu1 %v1771_v35 }
  0xa0   : > { %583 = vmatprep.mubr.bf16.mxu0 %v2034_v0  ;;  %656 = vmatprep.mubr.bf16.mxu1 %v2034_v0  ;;  %v1800_v0 = vld [vmem:[#allocation7 + $0xb0] sm:$0xff]  }
  0xa1   : > { %1576 = vmatpush3.bf16.msra.mxu0 %v1790_v55  ;;  %1616 = vmatpush3.bf16.msra.mxu1 %v1792_v56 }
  0xa2   : > { %1577 = vmatprep.subr.bf16.mxu0 %v1793_v57  ;;  %1617 = vmatprep.subr.bf16.mxu1 %v1795_v58 }
  0xa5   : > { %1578 = vmatpush3.bf16.msra.mxu0 %v1794_v59  ;;  %1618 = vmatpush3.bf16.msra.mxu1 %v1796_v60 }
  0xa6   : > { %1579 = vmatprep.subr.bf16.mxu0 %v1797_v61  ;;  %1619 = vmatprep.subr.bf16.mxu1 %v1799_v62 }
  0xa7   : > { %584 = vmatmul.mubr.bf16.gmra.mrb[12].mxu0 %v1772_v36  ;;  %657 = vmatmul.mubr.bf16.gmra.mrb[12].mxu1 %v1772_v36 }
  0xa9   : > { %1580 = vmatpush3.bf16.msra.mxu0 %v1798_v63  ;;  %1620 = vmatpush3.bf16.msra.mxu1 %v1800_v0 }
  0xaa   : > { %1581 = vmatprep.subr.bf16.mxu0 %v1801_v1  ;;  %1621 = vmatprep.subr.bf16.mxu1 %v1803_v2 }
  0xad   : > { %1582 = vmatpush3.bf16.msra.mxu0 %v1802_v3  ;;  %1622 = vmatpush3.bf16.msra.mxu1 %v1804_v4 }
 0x162   : > { %v555_v16 = vpop.f32.mrb[0].mxu0  ;;  %v628_v17 = vpop.f32.mrb[0].mxu1 }
 0x163   : > { %v556_v18 = vadd.f32 %v555_v16, %v2275_v12  ;;  %v629_v19 = vadd.f32 %v628_v17, %v2277_v13  ;;  %v557_v20 = vpop.f32.mrb[1].mxu0  ;;  %v630_v21 = vpop.f32.mrb[1].mxu1 }
 0x164   : > { %v2286_v22 = vadd.f32 %v557_v20, %v2279_v14  ;;  %v2289_v23 = vadd.f32 %v630_v21, %v2281_v15  ;;  %v559_v24 = vpop.f32.mrb[2].mxu0  ;;  %v632_v25 = vpop.f32.mrb[2].mxu1 }
 0x165   : > { %v667_v26 = vmul.f32 %v556_v18, %v556_v18  ;;  %v2291_v27 = vmul.f32 0.5, %v556_v18  ;;  %v669_v28 = vmul.f32 %v629_v19, %v629_v19  ;;  %v2293_v29 = vmul.f32 0.5, %v629_v19  ;;  %v561_v30 = vpop.f32.mrb[3].mxu0  ;;  %v634_v31 = vpop.f32.mrb[3].mxu1 }
 0x166   : > { %v668_v32 = vmul.f32 %v2286_v22, %v2286_v22  ;;  %v670_v33 = vmul.f32 %v2289_v23, %v2289_v23  ;;  %v560_v34 = vadd.f32 %v559_v24, %v2275_v12  ;;  %v633_v35 = vadd.f32 %v632_v25, %v2277_v13 }
 0x167   : > { %v699_v36 = vmul.f32 %v667_v26, %v556_v18  ;;  %v701_v37 = vmul.f32 %v669_v28, %v629_v19  ;;  %v2302_v38 = vadd.f32 %v561_v30, %v2279_v14  ;;  %v2305_v39 = vadd.f32 %v634_v31, %v2281_v15 }
 0x168   : > { %v700_v40 = vmul.f32 %v668_v32, %v2286_v22  ;;  %v702_v41 = vmul.f32 %v670_v33, %v2289_v23  ;;  %v671_v42 = vmul.f32 %v560_v34, %v560_v34  ;;  %v2309_v43 = vmul.f32 0.5, %v560_v34 }
 0x169   : > { %v763_v44 = vmul.f32 0.044715, %v699_v36  ;;  %v765_v45 = vmul.f32 0.044715, %v701_v37  ;;  %v673_v46 = vmul.f32 %v633_v35, %v633_v35  ;;  %v2311_v47 = vmul.f32 0.5, %v633_v35 }
 0x16a   : > { %v764_v48 = vmul.f32 0.044715, %v700_v40  ;;  %v766_v49 = vmul.f32 0.044715, %v702_v41  ;;  %v703_v50 = vmul.f32 %v671_v42, %v560_v34  ;;  %v672_v51 = vmul.f32 %v2302_v38, %v2302_v38  ;;  %v565_v52 = vpop.f32.mrb[4].mxu0  ;;  %v638_v53 = vpop.f32.mrb[4].mxu1 }
 0x16b   : > { %v795_v54 = vadd.f32 %v763_v44, %v556_v18  ;;  %v797_v55 = vadd.f32 %v765_v45, %v629_v19  ;;  %v705_v56 = vmul.f32 %v673_v46, %v633_v35  ;;  %v674_v57 = vmul.f32 %v2305_v39, %v2305_v39  ;;  %v567_v58 = vpop.f32.mrb[5].mxu0  ;;  %v640_v59 = vpop.f32.mrb[5].mxu1 }
 0x16c   : > { %v796_v60 = vadd.f32 %v764_v48, %v2286_v22  ;;  %v798_v61 = vadd.f32 %v766_v49, %v2289_v23  ;;  %v767_v62 = vmul.f32 0.044715, %v703_v50  ;;  %v704_v63 = vmul.f32 %v672_v51, %v2302_v38  ;;  %v569_v0 = vpop.f32.mrb[6].mxu0  ;;  %v642_v1 = vpop.f32.mrb[6].mxu1 }
 0x16d   : > { %v827_v2 = vmul.f32 0.7978846, %v795_v54  ;;  %v829_v3 = vmul.f32 0.7978846, %v797_v55  ;;  %v769_v4 = vmul.f32 0.044715, %v705_v56  ;;  %v706_v5 = vmul.f32 %v674_v57, %v2305_v39 }
 0x16e   : > { %v828_v6 = vmul.f32 0.7978846, %v796_v60  ;;  %v830_v7 = vmul.f32 0.7978846, %v798_v61  ;;  %v799_v8 = vadd.f32 %v767_v62, %v560_v34  ;;  %v768_v9 = vmul.f32 0.044715, %v704_v63 }
 0x16f   : > { %1805 = vtanh.f32 %v827_v2  ;;  %v801_v10 = vadd.f32 %v769_v4, %v633_v35  ;;  %v770_v11 = vmul.f32 0.044715, %v706_v5  ;;  %v2322_v16 = vadd.f32 %v565_v52, %v2275_v12  ;;  %v571_v17 = vpop.f32.mrb[7].mxu0  ;;  %v644_v18 = vpop.f32.mrb[7].mxu1 }
 0x170   : > { %1807 = vtanh.f32 %v829_v3  ;;  %v831_v19 = vmul.f32 0.7978846, %v799_v8  ;;  %v800_v20 = vadd.f32 %v768_v9, %v2302_v38  ;;  %v2326_v21 = vadd.f32 %v638_v53, %v2277_v13 }
 0x171   : > { %1809 = vtanh.f32 %v828_v6  ;;  %v833_v24 = vmul.f32 0.7978846, %v801_v10  ;;  %v802_v25 = vadd.f32 %v770_v11, %v2305_v39  ;;  %v675_v26 = vmul.f32 %v2322_v16, %v2322_v16 }
 0x172   : > { %1811 = vtanh.f32 %v830_v7  ;;  %v832_v28 = vmul.f32 0.7978846, %v800_v20  ;;  %v677_v30 = vmul.f32 %v2326_v21, %v2326_v21  ;;  %v2334_v31 = vadd.f32 %v567_v58, %v2279_v14  ;;  %v2336_v32 = vpop.f32.mrb[8].mxu0  ;;  %v2338_v33 = vpop.f32.mrb[8].mxu1 }
 0x173   : > { %1813 = vtanh.f32 %v831_v19  ;;  %v834_v34 = vmul.f32 0.7978846, %v802_v25  ;;  %v707_v35 = vmul.f32 %v675_v26, %v2322_v16  ;;  %v2342_v36 = vadd.f32 %v640_v59, %v2281_v15  ;;  %v2344_v37 = vpop.f32.mrb[9].mxu0  ;;  %v2346_v40 = vpop.f32.mrb[9].mxu1 }
 0x174   : > { %1815 = vtanh.f32 %v833_v24  ;;  %v709_v41 = vmul.f32 %v677_v30, %v2326_v21  ;;  %v676_v42 = vmul.f32 %v2334_v31, %v2334_v31  ;;  %v2352_v44 = vadd.f32 %v569_v0, %v2275_v12  ;;  %v2354_v45 = vpop.f32.mrb[10].mxu0  ;;  %v2356_v46 = vpop.f32.mrb[10].mxu1 }
 0x175   : > { %1817 = vtanh.f32 %v832_v28  ;;  %v771_v48 = vmul.f32 0.044715, %v707_v35  ;;  %v678_v49 = vmul.f32 %v2342_v36, %v2342_v36  ;;  %v2361_v50 = vadd.f32 %v642_v1, %v2277_v13  ;;  %v2363_v51 = vpop.f32.mrb[11].mxu0  ;;  %v2365_v52 = vpop.f32.mrb[11].mxu1 }
 0x176   : > { %1819 = vtanh.f32 %v834_v34  ;;  %v773_v53 = vmul.f32 0.044715, %v709_v41  ;;  %v708_v54 = vmul.f32 %v676_v42, %v2334_v31  ;;  %v679_v55 = vmul.f32 %v2352_v44, %v2352_v44 }
 0x177   : > { %v803_v56 = vadd.f32 %v771_v48, %v2322_v16  ;;  %v710_v57 = vmul.f32 %v678_v49, %v2342_v36  ;;  %v681_v58 = vmul.f32 %v2361_v50, %v2361_v50  ;;  %v2375_v59 = vadd.f32 %v571_v17, %v2279_v14 }
 0x178   : > { %v805_v60 = vadd.f32 %v773_v53, %v2326_v21  ;;  %v772_v61 = vmul.f32 0.044715, %v708_v54  ;;  %v711_v62 = vmul.f32 %v679_v55, %v2352_v44  ;;  %v2380_v63 = vadd.f32 %v644_v18, %v2281_v15 }
 0x179   : > { %v1806_v0 = vpop.eup %1805  ;;  %v835_v1 = vmul.f32 0.7978846, %v803_v56  ;;  %v774_v2 = vmul.f32 0.044715, %v710_v57  ;;  %v713_v3 = vmul.f32 %v681_v58, %v2361_v50  ;;  %v680_v4 = vmul.f32 %v2375_v59, %v2375_v59 }
 0x17a   : > { %v1808_v5 = vpop.eup %1807  ;;  %v891_v6 = vadd.f32 1.0, %v1806_v0  ;;  %v837_v7 = vmul.f32 0.7978846, %v805_v60  ;;  %v804_v8 = vadd.f32 %v772_v61, %v2334_v31  ;;  %v775_v9 = vmul.f32 0.044715, %v711_v62  ;;  %v2386_v10 = vpop.f32.mrb[12].mxu0 }
 0x17b   : > { %v2388_v11 = vpop.eup %1809  ;;  %v893_v17 = vadd.f32 1.0, %v1808_v5  ;;  %1821 = vtanh.f32 %v835_v1  ;;  %v806_v18 = vadd.f32 %v774_v2, %v2342_v36  ;;  %v777_v19 = vmul.f32 0.044715, %v713_v3  ;;  %v2391_v20 = vpop.f32.mrb[12].mxu1 }
 0x17c   : > { %v2393_v24 = vpop.f32.mrb[13].mxu0  ;;  %v2395_v25 = vpop.eup %1811  ;;  %v2398_v26 = vmul.f32 %v891_v6, %v2291_v27  ;;  %1823 = vtanh.f32 %v837_v7  ;;  %v836_v28 = vmul.f32 0.7978846, %v804_v8  ;;  %v807_v30 = vadd.f32 %v775_v9, %v2352_v44 }
 0x17d   : > { %v2401_v34 = vpop.f32.mrb[13].mxu1  ;;  %v2403_v35 = vpop.f32.mrb[14].mxu0  ;;  %v2406_v42 = vmul.f32 %v893_v17, %v2293_v29  ;;  %v838_v48 = vmul.f32 0.7978846, %v806_v18  ;;  %v809_v49 = vadd.f32 %v777_v19, %v2361_v50  ;;  %v712_v53 = vmul.f32 %v680_v4, %v2375_v59 }
 0x17e   : > { %v1814_v41 = vpop.eup %1813  ;;  %v2410_v54 = vpop.f32.mrb[14].mxu1  ;;  %1825 = vtanh.f32 %v836_v28  ;;  %v839_v57 = vmul.f32 0.7978846, %v807_v30  ;;  %v682_v58 = vmul.f32 %v2380_v63, %v2380_v63  ;;  %v2428_v4 = vadd.f32 %v2336_v32, %v2275_v12 }
 0x17f   : > { %v2412_v27 = vpop.f32.mrb[15].mxu0  ;;  %v1816_v55 = vpop.eup %1815  ;;  %v895_v56 = vadd.f32 1.0, %v1814_v41  ;;  %1827 = vtanh.f32 %v838_v48  ;;  %v841_v62 = vmul.f32 0.7978846, %v809_v49  ;;  %v776_v0 = vmul.f32 0.044715, %v712_v53 }
 0x180   : > { %v2416_v60 = vpop.f32.mrb[15].mxu1  ;;  %v2418_v29 = vpop.eup %1817  ;;  %v897_v61 = vadd.f32 1.0, %v1816_v55  ;;  %1829 = vtanh.f32 %v839_v57  ;;  %v714_v3 = vmul.f32 %v682_v58, %v2380_v63  ;;  %v2436_v7 = vadd.f32 %v2338_v33, %v2277_v13 }
 0x181   : > { %v2420_v1 = vpop.eup %1819  ;;  %v2423_v2 = vmul.f32 %v895_v56, %v2309_v43  ;;  %1831 = vtanh.f32 %v841_v62  ;;  %v808_v6 = vadd.f32 %v776_v0, %v2375_v59  ;;  %v683_v43 = vmul.f32 %v2428_v4, %v2428_v4 }
 0x182   : > { %v2431_v5 = vmul.f32 %v897_v61, %v2311_v47  ;;  %v778_v8 = vmul.f32 0.044715, %v714_v3  ;;  %v2442_v9 = vadd.f32 %v2344_v37, %v2279_v14  ;;  %v2446_v32 = vadd.f32 %v2346_v40, %v2281_v15 }
 0x183   : > { %v840_v47 = vmul.f32 0.7978846, %v808_v6  ;;  %v685_v17 = vmul.f32 %v2436_v7, %v2436_v7  ;;  %v2452_v33 = vadd.f32 %v2354_v45, %v2275_v12  ;;  %v2456_v18 = vadd.f32 %v2356_v46, %v2277_v13 }
 0x184   : > { %v810_v19 = vadd.f32 %v778_v8, %v2380_v63  ;;  %v715_v37 = vmul.f32 %v683_v43, %v2428_v4  ;;  %v684_v40 = vmul.f32 %v2442_v9, %v2442_v9  ;;  %v686_v28 = vmul.f32 %v2446_v32, %v2446_v32 }
 0x185   : > { %v2464_v30 = vpop.eup %1821  ;;  %1833 = vtanh.f32 %v840_v47  ;;  %v717_v45 = vmul.f32 %v685_v17, %v2436_v7  ;;  %v687_v41 = vmul.f32 %v2452_v33, %v2452_v33  ;;  %v689_v46 = vmul.f32 %v2456_v18, %v2456_v18 }
 0x186   : > { %v2471_v48 = vpop.eup %1823  ;;  %v842_v49 = vmul.f32 0.7978846, %v810_v19  ;;  %v779_v53 = vmul.f32 0.044715, %v715_v37  ;;  %v716_v55 = vmul.f32 %v684_v40, %v2442_v9  ;;  %v718_v56 = vmul.f32 %v686_v28, %v2446_v32 }
 0x187   : > { %v781_v57 = vmul.f32 0.044715, %v717_v45  ;;  %v719_v58 = vmul.f32 %v687_v41, %v2452_v33  ;;  %v721_v61 = vmul.f32 %v689_v46, %v2456_v18  ;;  %v2479_v62 = vadd.f32 %v2363_v51, %v2279_v14 }
 0x188   : > { %v2481_v0 = vpop.eup %1825  ;;  %1835 = vtanh.f32 %v842_v49  ;;  %v811_v3 = vadd.f32 %v779_v53, %v2428_v4  ;;  %v780_v6 = vmul.f32 0.044715, %v716_v55  ;;  %v782_v8 = vmul.f32 0.044715, %v718_v56 }
 0x189   : > { %v2484_v43 = vpop.eup %1827  ;;  %v813_v47 = vadd.f32 %v781_v57, %v2436_v7  ;;  %v783_v17 = vmul.f32 0.044715, %v719_v58  ;;  %v785_v19 = vmul.f32 0.044715, %v721_v61  ;;  %v688_v37 = vmul.f32 %v2479_v62, %v2479_v62 }
 0x18a   : > { %v2489_v40 = vpop.eup %1829  ;;  %v843_v51 = vmul.f32 0.7978846, %v811_v3  ;;  %v812_v28 = vadd.f32 %v780_v6, %v2442_v9  ;;  %v814_v45 = vadd.f32 %v782_v8, %v2446_v32  ;;  %v2495_v41 = vadd.f32 %v2365_v52, %v2281_v15 }
 0x18b   : > { %v2497_v46 = vpop.eup %1831  ;;  %v845_v49 = vmul.f32 0.7978846, %v813_v47  ;;  %v815_v53 = vadd.f32 %v783_v17, %v2452_v33  ;;  %v817_v55 = vadd.f32 %v785_v19, %v2456_v18  ;;  %v720_v56 = vmul.f32 %v688_v37, %v2479_v62 }
 0x18c   : > { %1837 = vtanh.f32 %v843_v51  ;;  %v844_v57 = vmul.f32 0.7978846, %v812_v28  ;;  %v846_v58 = vmul.f32 0.7978846, %v814_v45  ;;  %v690_v61 = vmul.f32 %v2495_v41, %v2495_v41 }
 0x18d   : > { %1839 = vtanh.f32 %v845_v49  ;;  %v847_v3 = vmul.f32 0.7978846, %v815_v53  ;;  %v849_v6 = vmul.f32 0.7978846, %v817_v55  ;;  %v784_v52 = vmul.f32 0.044715, %v720_v56 }
 0x18e   : > { %1841 = vtanh.f32 %v844_v57  ;;  %v722_v8 = vmul.f32 %v690_v61, %v2495_v41  ;;  %v2507_v47 = vadd.f32 %v2386_v10, %v2275_v12  ;;  %v2511_v17 = vadd.f32 %v2391_v20, %v2277_v13 }
 0x18f   : > { %v2513_v19 = vpop.eup %1833  ;;  %1843 = vtanh.f32 %v846_v58  ;;  %v816_v37 = vadd.f32 %v784_v52, %v2479_v62  ;;  %v2518_v51 = vadd.f32 %v2393_v24, %v2279_v14  ;;  %v2522_v28 = vadd.f32 %v2401_v34, %v2281_v15 }
 0x190   : > { %2746 = vst [vmem:[#allocation12_spill] sm:$0xff] %v2507_v47  ;;  %2747 = vst [vmem:[#allocation13_spill] sm:$0xff] %v2511_v17  ;;  %1845 = vtanh.f32 %v847_v3  ;;  %v786_v10 = vmul.f32 0.044715, %v722_v8  ;;  %v691_v45 = vmul.f32 %v2507_v47, %v2507_v47  ;;  %v693_v20 = vmul.f32 %v2511_v17, %v2511_v17 }
 0x191   : > { %1847 = vtanh.f32 %v849_v6  ;;  %v848_v49 = vmul.f32 0.7978846, %v816_v37  ;;  %v692_v53 = vmul.f32 %v2518_v51, %v2518_v51  ;;  %v694_v24 = vmul.f32 %v2522_v28, %v2522_v28 }
 0x192   : > { %v2532_v55 = vpop.eup %1835  ;;  %v818_v34 = vadd.f32 %v786_v10, %v2495_v41  ;;  %v723_v56 = vmul.f32 %v691_v45, %v2507_v47  ;;  %v725_v57 = vmul.f32 %v693_v20, %v2511_v17  ;;  %v2539_v58 = vadd.f32 %v2403_v35, %v2275_v12 }
 0x193   : > { %1849 = vtanh.f32 %v848_v49  ;;  %v724_v61 = vmul.f32 %v692_v53, %v2518_v51  ;;  %v726_v3 = vmul.f32 %v694_v24, %v2522_v28  ;;  %v2545_v6 = vadd.f32 %v2410_v54, %v2277_v13 }
 0x194   : > { %2748 = vst [vmem:[#allocation14_spill] sm:$0xff] %v2539_v58  ;;  %v850_v52 = vmul.f32 0.7978846, %v818_v34  ;;  %v787_v8 = vmul.f32 0.044715, %v723_v56  ;;  %v695_v10 = vmul.f32 %v2539_v58, %v2539_v58  ;;  %v2553_v35 = vadd.f32 %v2412_v27, %v2279_v14 }
 0x195   : > { %v789_v37 = vmul.f32 0.044715, %v725_v57  ;;  %v788_v45 = vmul.f32 0.044715, %v724_v61  ;;  %v790_v20 = vmul.f32 0.044715, %v726_v3  ;;  %v697_v12 = vmul.f32 %v2545_v6, %v2545_v6 }
 0x196   : > { %v2555_v49 = vpop.eup %1837  ;;  %1851 = vtanh.f32 %v850_v52  ;;  %v819_v13 = vadd.f32 %v787_v8, %v2507_v47  ;;  %v727_v53 = vmul.f32 %v695_v10, %v2539_v58  ;;  %v696_v14 = vmul.f32 %v2553_v35, %v2553_v35 }
 0x197   : > { %v821_v54 = vadd.f32 %v789_v37, %v2511_v17  ;;  %v2560_v24 = vpop.eup %1839  ;;  %v820_v34 = vadd.f32 %v788_v45, %v2518_v51  ;;  %v822_v56 = vadd.f32 %v790_v20, %v2522_v28  ;;  %v729_v57 = vmul.f32 %v697_v12, %v2545_v6 }
 0x198   : > { %v2567_v27 = vpop.eup %1841  ;;  %v851_v61 = vmul.f32 0.7978846, %v819_v13  ;;  %v791_v52 = vmul.f32 0.044715, %v727_v53  ;;  %v2571_v8 = vadd.f32 %v2416_v60, %v2281_v15  ;;  %v728_v20 = vmul.f32 %v696_v14, %v2553_v35 }
 0x199   : > { %v853_v3 = vmul.f32 0.7978846, %v821_v54  ;;  %v2573_v37 = vpop.eup %1843  ;;  %v852_v10 = vmul.f32 0.7978846, %v820_v34  ;;  %v854_v45 = vmul.f32 0.7978846, %v822_v56 }
 0x19a   : > { %v793_v17 = vmul.f32 0.044715, %v729_v57  ;;  %v2576_v12 = vpop.eup %1845  ;;  %1853 = vtanh.f32 %v851_v61  ;;  %v823_v47 = vadd.f32 %v791_v52, %v2539_v58  ;;  %v698_v13 = vmul.f32 %v2571_v8, %v2571_v8 }
 0x19b   : > { %v732_v54 = vmul.f32 0.5, %v2286_v22  ;;  %v2582_v53 = vpop.eup %1847  ;;  %1855 = vtanh.f32 %v853_v3  ;;  %v792_v60 = vmul.f32 0.044715, %v728_v20  ;;  %v736_v34 = vmul.f32 0.5, %v2302_v38 }
 0x19c   : > { %v825_v15 = vadd.f32 %v793_v17, %v2545_v6  ;;  %1857 = vtanh.f32 %v852_v10  ;;  %v855_v56 = vmul.f32 0.7978846, %v823_v47  ;;  %v730_v57 = vmul.f32 %v698_v13, %v2571_v8 }
 0x19d   : > { %v892_v14 = vadd.f32 1.0, %v2388_v11  ;;  %v2588_v61 = vpop.eup %1849  ;;  %1859 = vtanh.f32 %v854_v45  ;;  %v824_v22 = vadd.f32 %v792_v60, %v2553_v35  ;;  %v896_v58 = vadd.f32 1.0, %v2418_v29 }
 0x19e   : > { %v857_v52 = vmul.f32 0.7978846, %v825_v15  ;;  %1861 = vtanh.f32 %v855_v56  ;;  %v794_v3 = vmul.f32 0.044715, %v730_v57  ;;  %v734_v20 = vmul.f32 0.5, %v2289_v23 }
 0x19f   : > { %v924_v17 = vmul.f32 %v892_v14, %v732_v54  ;;  %v856_v38 = vmul.f32 0.7978846, %v824_v22  ;;  %v928_v47 = vmul.f32 %v896_v58, %v736_v34  ;;  %v738_v10 = vmul.f32 0.5, %v2305_v39 }
 0x1a0   : > { %1863 = vtanh.f32 %v857_v52  ;;  %v1852_v13 = vpop.eup %1851  ;;  %v826_v11 = vadd.f32 %v794_v3, %v2571_v8  ;;  %v894_v45 = vadd.f32 1.0, %v2395_v25  ;;  %v898_v15 = vadd.f32 1.0, %v2420_v1 }
 0x1a1   : > { %v955_v29 = vpack.c.bf16 %v2423_v2, %v2398_v26  ;;  %1865 = vtanh.f32 %v856_v38  ;;  %v956_v60 = vpack.c.bf16 %v928_v47, %v924_v17  ;;  %v957_v23 = vpack.c.bf16 %v2431_v5, %v2406_v42 }
 0x1a2   : > { %v740_v54 = vmul.f32 0.5, %v2334_v31  ;;  %v858_v58 = vmul.f32 0.7978846, %v826_v11  ;;  %v926_v34 = vmul.f32 %v894_v45, %v734_v20  ;;  %v930_v39 = vmul.f32 %v898_v15, %v738_v10 }
 0x1a3   : > { %v744_v56 = vmul.f32 0.5, %v2375_v59  ;;  %1266 = vmatprep.mubr.bf16.mxu0 %v956_v60  ;;  %v900_v25 = vadd.f32 1.0, %v2481_v0  ;;  %v904_v1 = vadd.f32 1.0, %v2513_v19  ;;  %v742_v57 = vmul.f32 0.5, %v2342_v36 }
 0x1a4   : > { %v746_v26 = vmul.f32 0.5, %v2380_v63  ;;  %v2607_v2 = vpop.eup %1853  ;;  %1867 = vtanh.f32 %v858_v58  ;;  %v958_v42 = vpack.c.bf16 %v930_v39, %v926_v34  ;;  %1267 = vmatmul.mubr.bf16.vlgmr.msra.gmra.mrb[16].mxu0 %v955_v29  ;;  %v902_v31 = vadd.f32 1.0, %v2484_v43 }
 0x1a5   : > { %v906_v5 = vadd.f32 1.0, %v2532_v55  ;;  %v2611_v14 = vpop.eup %1855  ;;  %v932_v59 = vmul.f32 %v900_v25, %v740_v54  ;;  %v936_v52 = vmul.f32 %v904_v1, %v744_v56  ;;  %v739_v0 = vmul.f32 0.5, %v2322_v16 }
 0x1a6   : > { %v743_v19 = vmul.f32 0.5, %v2352_v44  ;;  %v1858_v36 = vpop.eup %1857  ;;  %1331 = vmatprep.mubr.bf16.mxu1 %v958_v42  ;;  %v934_v63 = vmul.f32 %v902_v31, %v742_v57  ;;  %v899_v3 = vadd.f32 1.0, %v2464_v30  ;;  %v903_v17 = vadd.f32 1.0, %v2489_v40 }
 0x1a7   : > { %v938_v22 = vmul.f32 %v906_v5, %v746_v26  ;;  %v1860_v20 = vpop.eup %1859  ;;  %1332 = vmatmul.mubr.bf16.vlgmr.msra.gmra.mrb[16].mxu1 %v957_v23  ;;  %v960_v43 = vpack.c.bf16 %v936_v52, %v932_v59  ;;  %v741_v55 = vmul.f32 0.5, %v2326_v21  ;;  %v745_v38 = vmul.f32 0.5, %v2361_v50 }
 0x1a8   : > { %v901_v47 = vadd.f32 1.0, %v2471_v48  ;;  %v1862_v16 = vpop.eup %1861  ;;  %v931_v44 = vmul.f32 %v899_v3, %v739_v0  ;;  %v935_v11 = vmul.f32 %v903_v17, %v743_v19  ;;  %v905_v45 = vadd.f32 1.0, %v2497_v46  ;;  %v2749_v17 = vld [vmem:[#allocation12_spill] sm:$0xff] }
 0x1a9   : > { %v962_v10 = vpack.c.bf16 %v938_v22, %v934_v63  ;;  %1274 = vmatprep.mubr.bf16.mxu0 %v960_v43  ;;  %v748_v40 = vmul.f32 0.5, %v2442_v9  ;;  %v752_v29 = vmul.f32 0.5, %v2479_v62  ;;  %v908_v21 = vadd.f32 1.0, %v2567_v27 }
 0x1aa   : > { %v2621_v15 = vpop.eup %1863  ;;  %v933_v30 = vmul.f32 %v901_v47, %v741_v55  ;;  %v959_v50 = vpack.c.bf16 %v935_v11, %v931_v44  ;;  %v937_v60 = vmul.f32 %v905_v45, %v745_v38  ;;  %v912_v48 = vadd.f32 1.0, %v2588_v61  ;;  %v2750_v55 = vld [vmem:[#allocation14_spill] sm:$0xff]  ;;  %v2751_v44 = vld [vmem:[#allocation13_spill] sm:$0xff] }
 0x1ab   : > { %1339 = vmatprep.mubr.bf16.mxu1 %v962_v10  ;;  %v750_v23 = vmul.f32 0.5, %v2446_v32  ;;  %v1866_v54 = vpop.eup %1865  ;;  %v940_v58 = vmul.f32 %v908_v21, %v748_v40  ;;  %v754_v46 = vmul.f32 0.5, %v2495_v41  ;;  %v910_v34 = vadd.f32 1.0, %v2573_v37 }
 0x1ac   : > { %v914_v39 = vadd.f32 1.0, %v1852_v13  ;;  %1275 = vmatmul.mubr.bf16.gmra.mrb[20].mxu0 %v959_v50  ;;  %v961_v9 = vpack.c.bf16 %v937_v60, %v933_v30  ;;  %v944_v56 = vmul.f32 %v912_v48, %v752_v29  ;;  %v747_v62 = vmul.f32 0.5, %v2428_v4 }
 0x1ad   : > { %v751_v27 = vmul.f32 0.5, %v2452_v33  ;;  %v942_v25 = vmul.f32 %v910_v34, %v750_v23  ;;  %v907_v61 = vadd.f32 1.0, %v2555_v49  ;;  %v911_v32 = vadd.f32 1.0, %v2576_v12 }
 0x1ae   : > { %v946_v1 = vmul.f32 %v914_v39, %v754_v46  ;;  %v1868_v57 = vpop.eup %1867  ;;  %v964_v26 = vpack.c.bf16 %v944_v56, %v940_v58  ;;  %v749_v41 = vmul.f32 0.5, %v2436_v7  ;;  %v753_v37 = vmul.f32 0.5, %v2456_v18 }
 0x1af   : > { %v909_v13 = vadd.f32 1.0, %v2560_v24  ;;  %1340 = vmatmul.mubr.bf16.gmra.mrb[20].mxu1 %v961_v9  ;;  %v939_v31 = vmul.f32 %v907_v61, %v747_v62  ;;  %v943_v4 = vmul.f32 %v911_v32, %v751_v27  ;;  %v913_v33 = vadd.f32 1.0, %v2582_v53 }
 0x1b0   : > { %v966_v42 = vpack.c.bf16 %v946_v1, %v942_v25  ;;  %1282 = vmatprep.mubr.bf16.mxu0 %v964_v26  ;;  %v756_v49 = vmul.f32 0.5, %v2518_v51  ;;  %v760_v12 = vmul.f32 0.5, %v2553_v35  ;;  %v916_v59 = vadd.f32 1.0, %v1858_v36 }
 0x1b1   : > { %v941_v5 = vmul.f32 %v909_v13, %v749_v41  ;;  %v963_v52 = vpack.c.bf16 %v943_v4, %v939_v31  ;;  %v945_v7 = vmul.f32 %v913_v33, %v753_v37  ;;  %v920_v0 = vadd.f32 1.0, %v1866_v54 }
 0x1b2   : > { %1347 = vmatprep.mubr.bf16.mxu1 %v966_v42  ;;  %v758_v18 = vmul.f32 0.5, %v2522_v28  ;;  %v948_v24 = vmul.f32 %v916_v59, %v756_v49  ;;  %v762_v19 = vmul.f32 0.5, %v2571_v8  ;;  %v918_v63 = vadd.f32 1.0, %v1860_v20 }
 0x1b3   : > { %v922_v22 = vadd.f32 1.0, %v1868_v57  ;;  %v965_v3 = vpack.c.bf16 %v945_v7, %v941_v5  ;;  %v952_v53 = vmul.f32 %v920_v0, %v760_v12  ;;  %v755_v43 = vmul.f32 0.5, %v2749_v17 }
 0x1b4   : > { %v759_v51 = vmul.f32 0.5, %v2750_v55  ;;  %1283 = vmatmul.mubr.bf16.gmra.mrb[24].mxu0 %v963_v52  ;;  %v950_v35 = vmul.f32 %v918_v63, %v758_v18  ;;  %v915_v38 = vadd.f32 1.0, %v2607_v2  ;;  %v919_v47 = vadd.f32 1.0, %v1862_v16 }
 0x1b5   : > { %v954_v36 = vmul.f32 %v922_v22, %v762_v19  ;;  %v968_v10 = vpack.c.bf16 %v952_v53, %v948_v24  ;;  %v757_v28 = vmul.f32 0.5, %v2751_v44  ;;  %v761_v11 = vmul.f32 0.5, %v2545_v6  ;;  %v2652_v6 = vld [vmem:[%s2728_s4] ss:$0 sm:$0xff] }
 0x1b6   : > { %v917_v8 = vadd.f32 1.0, %v2611_v14  ;;  %v947_v45 = vmul.f32 %v915_v38, %v755_v43  ;;  %v951_v30 = vmul.f32 %v919_v47, %v759_v51  ;;  %v921_v40 = vadd.f32 1.0, %v2621_v15 }
 0x1b7   : > { %v970_v20 = vpack.c.bf16 %v954_v36, %v950_v35  ;;  %1348 = vmatmul.mubr.bf16.gmra.mrb[24].mxu1 %v965_v3  ;;  %1290 = vmatprep.mubr.bf16.mxu0 %v968_v10 }
 0x1b8   : > { %v967_v29 = vpack.c.bf16 %v951_v30, %v947_v45  ;;  %v949_v21 = vmul.f32 %v917_v8, %v757_v28  ;;  %v953_v2 = vmul.f32 %v921_v40, %v761_v11 }
 0x1b9   : > { %1355 = vmatprep.mubr.bf16.mxu1 %v970_v20 }
 0x1ba   : > { %v969_v16 = vpack.c.bf16 %v953_v2, %v949_v21 }
 0x1bc   : > { %1291 = vmatmul.mubr.bf16.gmra.mrb[28].mxu0 %v967_v29 }
 0x1bf   : > { %1356 = vmatmul.mubr.bf16.gmra.mrb[28].mxu1 %v969_v16 }
 0x277   : > { %v1583_v50 = vpop.f32.mrb[16].mxu0 }
 0x278   : > { %v1584_v14 = vpop.f32.mrb[17].mxu0 }
 0x279   : > { %v1585_v60 = vadd.f32 %v1584_v14, %v1583_v50  ;;  %v1586_v48 = vpop.f32.mrb[18].mxu0 }
 0x27a   : > { %v1623_v15 = vpop.f32.mrb[16].mxu1  ;;  %v1587_v23 = vpop.f32.mrb[19].mxu0 }
 0x27b   : > { %v1269_v54 = vadd.f32 %v1585_v60, %v2652_v6  ;;  %v1624_v58 = vpop.f32.mrb[17].mxu1  ;;  %v1588_v46 = vadd.f32 %v1587_v23, %v1586_v48 }
 0x27c   : > { %v1625_v34 = vadd.f32 %v1624_v58, %v1623_v15  ;;  %v1626_v39 = vpop.f32.mrb[18].mxu1 }
 0x27d   : > { %v1272_v9 = vadd.f32 %v1588_v46, %v2652_v6  ;;  %v1627_v56 = vpop.f32.mrb[19].mxu1 }
 0x27e   : > { %v1334_v62 = vadd.f32 %v1625_v34, %v1269_v54  ;;  %v1628_v27 = vadd.f32 %v1627_v56, %v1626_v39 }
 0x27f   : > { %v1589_v25 = vpop.f32.mrb[20].mxu0 }
 0x280   : > { %1364 = vst [vmem:[%s2657_s28] sm:$0xff] %v1334_v62  ;;  %v1337_v1 = vadd.f32 %v1628_v27, %v1272_v9  ;;  %v1590_v61 = vpop.f32.mrb[21].mxu0 }
 0x281   : > { %v1591_v32 = vadd.f32 %v1590_v61, %v1589_v25  ;;  %v1592_v57 = vpop.f32.mrb[22].mxu0 }
 0x282   : > { %1365 = vst [vmem:[%s2657_s28 + $0x8] sm:$0xff] %v1337_v1  ;;  %v1629_v26 = vpop.f32.mrb[20].mxu1  ;;  %v1593_v41 = vpop.f32.mrb[23].mxu0 }
 0x283   : > { %v1277_v37 = vadd.f32 %v1591_v32, %v2652_v6  ;;  %v1630_v13 = vpop.f32.mrb[21].mxu1  ;;  %v1594_v42 = vadd.f32 %v1593_v41, %v1592_v57 }
 0x284   : > { %v1631_v31 = vadd.f32 %v1630_v13, %v1629_v26  ;;  %v1632_v4 = vpop.f32.mrb[22].mxu1 }
 0x285   : > { %v1280_v33 = vadd.f32 %v1594_v42, %v2652_v6  ;;  %v1633_v5 = vpop.f32.mrb[23].mxu1 }
 0x286   : > { %v1342_v49 = vadd.f32 %v1631_v31, %v1277_v37  ;;  %v1634_v12 = vadd.f32 %v1633_v5, %v1632_v4 }
 0x287   : > { %v1595_v59 = vpop.f32.mrb[24].mxu0 }
 0x288   : > { %1366 = vst [vmem:[%s2657_s28 + $0x10] sm:$0xff] %v1342_v49  ;;  %v1345_v52 = vadd.f32 %v1634_v12, %v1280_v33  ;;  %v1596_v7 = vpop.f32.mrb[25].mxu0 }
 0x289   : > { %v1597_v0 = vadd.f32 %v1596_v7, %v1595_v59  ;;  %v1598_v18 = vpop.f32.mrb[26].mxu0 }
 0x28a   : > { %1367 = vst [vmem:[%s2657_s28 + $0x18] sm:$0xff] %v1345_v52  ;;  %v1635_v24 = vpop.f32.mrb[24].mxu1  ;;  %v1599_v19 = vpop.f32.mrb[27].mxu0 }
 0x28b   : > { %v1285_v63 = vadd.f32 %v1597_v0, %v2652_v6  ;;  %v1636_v22 = vpop.f32.mrb[25].mxu1  ;;  %v1600_v3 = vadd.f32 %v1599_v19, %v1598_v18 }
 0x28c   : > { %v1637_v53 = vadd.f32 %v1636_v22, %v1635_v24  ;;  %v1638_v17 = vpop.f32.mrb[26].mxu1 }
 0x28d   : > { %v1288_v43 = vadd.f32 %v1600_v3, %v2652_v6  ;;  %v1639_v55 = vpop.f32.mrb[27].mxu1 }
 0x28e   : > { %v1350_v51 = vadd.f32 %v1637_v53, %v1285_v63  ;;  %v1640_v35 = vadd.f32 %v1639_v55, %v1638_v17 }
 0x28f   : > { %v1601_v36 = vpop.f32.mrb[28].mxu0 }
 0x290   : > { %1368 = vst [vmem:[%s2657_s28 + $0x20] sm:$0xff] %v1350_v51  ;;  %v1353_v38 = vadd.f32 %v1640_v35, %v1288_v43  ;;  %v1602_v47 = vpop.f32.mrb[29].mxu0 }
 0x291   : > { %v1603_v10 = vadd.f32 %v1602_v47, %v1601_v36  ;;  %v1604_v44 = vpop.f32.mrb[30].mxu0 }
 0x292   : > { %1369 = vst [vmem:[%s2657_s28 + $0x28] sm:$0xff] %v1353_v38  ;;  %v1641_v28 = vpop.f32.mrb[28].mxu1  ;;  %v1605_v11 = vpop.f32.mrb[31].mxu0 }
 0x293   : > { %v1293_v8 = vadd.f32 %v1603_v10, %v2652_v6  ;;  %v1642_v20 = vpop.f32.mrb[29].mxu1  ;;  %v1606_v45 = vadd.f32 %v1605_v11, %v1604_v44 }
 0x294   : > { %v1643_v30 = vadd.f32 %v1642_v20, %v1641_v28  ;;  %v1644_v40 = vpop.f32.mrb[30].mxu1 }
 0x295   : > { %v1296_v29 = vadd.f32 %v1606_v45, %v2652_v6  ;;  %v1645_v21 = vpop.f32.mrb[31].mxu1 }
 0x296   : > { %v1358_v2 = vadd.f32 %v1643_v30, %v1293_v8  ;;  %v1646_v16 = vadd.f32 %v1645_v21, %v1644_v40 }
 0x298   : > { %1370 = vst [vmem:[%s2657_s28 + $0x30] sm:$0xff] %v1358_v2  ;;  %v1361_v50 = vadd.f32 %v1646_v16, %v1296_v29 }
 0x29a   : > { %1371 = vst [vmem:[%s2657_s28 + $0x38] sm:$0xff] %v1361_v50 }
 0x29b   : > { %1968 = shalt.err (!%p1965_p2)
}
 0x29c   : > { %s1969_s24 = scalar_lea.hbm %s2678_s23, 1024  ;;  %s1973_s13 = scalar_lea.hbm %s2729_s5, 2048 }
 0x29d   : > { %p1970_p13 = scmp.ne.s32.totalorder %s2678_s23, %s1969_s24  ;;  %p1974_p4 = scmp.lt.u32.totalorder %s2678_s23, %s2729_s5 }
 0x29e   : > { %p1975_p7 = scmp.lt.u32.totalorder %s1973_s13, %s1969_s24  ;;  %p1977_p11 = scmp.lt.u32.totalorder %s1969_s24, %s2678_s23 }
 0x29f   : > { %p1971_p6 = pnand %p1970_p13, %p2752_p0 }
 0x2a0   : > { %p1976_p8 = por %p1975_p7, %p1974_p4 }
 0x2a1   : > { %p1972_p10 = pneg %p1971_p6 }
 0x2a2   : > { %p1978_p1 = por %p1977_p11, %p1976_p8 }
 0x2a4   : > { %p1979_p3 = pnand %p1978_p1, %p1972_p10 }
 0x2a6   : > { %1982 = shalt.err (!%p1979_p3)
}
 0x2a7   : > { %s2036_s15 = smov 128   ;;  %s2037_s30 = smov 8  }
 0x2a8   : > { %1657 = dma.vmem_to_hbm [thread:$0]  (%p2752_p0), %s2673_s14, 1024, %s2678_s23, %s1373_s7, %s2036_s15, %s2036_s15, %s2037_s30  }
 0x2a9 PF: > { %s1401_s11 = sand.u32 1, %s2013_s18   ;;  %p2753_p5 = scmp.ne.s32.totalorder %s2737_s25, 0 }
 0x2aa   : > { %p2754_p9 = scmp.ge.s32.totalorder %s2025_s21, 2  ;;  %s1402_s22 = scalar_lea.sflag [#allocation4], %s1401_s11 }
 0x2ac   : > { %p1671_p12 = pnand %p2754_p9, %p2753_p5 }
 0x2ae   : > { %2008 = dma.done.wait (!%p1671_p12), %s1402_s22, 1024  }
 0x2af   : > { %2010 = vsyncadd (!%p1671_p12), %s1402_s22, 4294966272  ;;  %p19_p2 = scmp.ge.s32.totalorder %s2181_s16, 4   ;;  %s2755_s18 = smov %s2017_s19 }
 0x2b0   : > { %s2756_s19 = smov %s2021_s20  ;;  %s2757_s20 = smov %s2190_s27 }
 0x2b1   : > { %s2758_s21 = smov %s2181_s16  ;;  %21 = sbr.rel (!%p19_p2) target bundleno = 6 (0x6), region = 93 }
 0x2b8   :  { %1407 = vsyncpa [#allocation3], 1 }
 0x2b9   :  { %1409 = vsyncpa [#allocation3 + $0x1], 1 }
 0x2ba   :  { %1410 = vsyncpa [#allocation6], 1 }
 0x2bb   :  { %1411 = vsyncpa [#allocation4], 1 }
 0x2bc   :  { %1413 = vsyncpa [#allocation4 + $0x1], 1 }

</bundles_post_ra>
